<compile_context>
chip_gen: v6e
topology: v6e:2x2x1
jax: 0.10.0
libtpu: 0.0.40
codegen_flags: <defaults>
</compile_context>

<pallas_src>
import jax
import jax.numpy as jnp
from jax.experimental import pallas as pl
from jax.experimental.pallas import tpu as pltpu

_LANES = 128
_SUBLANES = 8
_MAX_TILE_ROWS = 1024  # 1024 x 128 f32 = 512 KiB per block (x2 for double buffer)


def deft_kernel(beta_ref, kl_ref, out_ref, acc_ref):
    """beta_ref: SMEM f32[1]
       kl_ref:   VMEM native-dtype [tile_rows, 128] (current grid tile)
       out_ref:  VMEM f32[1, 1]
       acc_ref:  VMEM f32[8, 128] scratch accumulator (resident across grid)
    """
    k = pl.program_id(0)

    @pl.when(k == 0)
    def _init():
        acc_ref[...] = jnp.zeros_like(acc_ref)

    # Upcast the native-dtype tile and fold its row axis into the (8, 128)
    # accumulator: pure VPU adds, fully hidden under the DMA of the next tile.
    x = kl_ref[...].astype(jnp.float32)                      # (tile_rows, 128)
    acc_ref[...] += jnp.sum(x.reshape(-1, _SUBLANES, _LANES), axis=0)

    # Single cross-lane/sublane reduction + beta scaling at the final step.
    @pl.when(k == pl.num_programs(0) - 1)
    def _finalize():
        out_ref[...] = (beta_ref[0] * jnp.sum(acc_ref[...])).reshape(1, 1)


def _select_beta(betas_arr, global_step, stage_steps):
    # stage = min(global_step // stage_steps, len(betas) - 1)
    # Precondition (same as the PyTorch original): stage_steps != 0.
    n_betas = betas_arr.shape[0]
    gs = jnp.asarray(global_step, jnp.int32)
    ss = jnp.asarray(stage_steps, jnp.int32)
    stage = jnp.minimum(gs // ss, n_betas - 1)
    return betas_arr[stage]


def _round_up(x, m):
    return -(-x // m) * m


def deft_forward(kl, betas, global_step, stage_steps):
    """beta * kl.sum(), streamed through a tiled, pipelined Pallas kernel."""
    betas_arr = jnp.asarray(betas, dtype=jnp.float32)
    beta = _select_beta(betas_arr, global_step, stage_steps).reshape(1)

    # Flatten kl into a lane-dense (rows, 128) slab in its NATIVE dtype.
    flat = kl.reshape(-1)
    total = flat.shape[0]
    rows = _round_up(total, _LANES) // _LANES

    if rows <= _MAX_TILE_ROWS:
        tile_rows = _round_up(rows, _SUBLANES)
    else:
        tile_rows = _MAX_TILE_ROWS
    padded_rows = _round_up(rows, tile_rows)

    pad = padded_rows * _LANES - total
    if pad:
        # Zero padding is exact for a sum reduction.
        flat = jnp.concatenate([flat, jnp.zeros((pad,), dtype=flat.dtype)])
    slab = flat.reshape(padded_rows, _LANES)

    grid = (padded_rows // tile_rows,)

    out = pl.pallas_call(
        deft_kernel,
        out_shape=jax.ShapeDtypeStruct((1, 1), jnp.float32),
        grid=grid,
        in_specs=[
            pl.BlockSpec(memory_space=pltpu.MemorySpace.SMEM),        # beta
            pl.BlockSpec((tile_rows, _LANES), lambda k: (k, 0)),      # kl slab
        ],
        out_specs=pl.BlockSpec((1, 1), lambda k: (0, 0)),             # accumulator-resident
        scratch_shapes=[pltpu.VMEM((_SUBLANES, _LANES), jnp.float32)],
        compiler_params=pltpu.CompilerParams(
            dimension_semantics=("arbitrary",)),                      # reduction axis
    )(beta, slab)
    return out[0, 0]


if __name__ == "__main__":
    key = jax.random.PRNGKey(0)
    k1, k2 = jax.random.split(key)

    betas = [1.0, 4.0, 8.0, 16.0]   # gin "betas"
    stage_steps = 1000              # gin "stage_steps"
    global_step = 2500              # -> stage = min(2, 3) = 2 -> beta = 8.0
    stage_ref = min(global_step // stage_steps, len(betas) - 1)

    # Case 1: module-scale kl (batch=2, num_latents=32), f32.
    kl_small = jax.random.uniform(k1, (2, 32), dtype=jnp.float32)
    out_small = jax.block_until_ready(
        deft_forward(kl_small, betas, global_step, stage_steps))
    ref_small = jnp.float32(betas[stage_ref]) * jnp.sum(kl_small)
    assert jnp.allclose(out_small, ref_small, rtol=1e-6, atol=1e-5), (out_small, ref_small)

    # Case 2: larger bf16 kl exercising the tiled / pipelined path (grid > 1).
    kl_big = jax.random.uniform(k2, (256, 1024), dtype=jnp.float32).astype(jnp.bfloat16)
    out_big = jax.block_until_ready(
        deft_forward(kl_big, betas, global_step, stage_steps))
    ref_big = jnp.float32(betas[stage_ref]) * jnp.sum(kl_big.astype(jnp.float32))
    assert jnp.allclose(out_big, ref_big, rtol=1e-4, atol=1e-2), (out_big, ref_big)

    print("KERNEL_OK")
</pallas_src>

<mosaic_0001>
module attributes {stable_mosaic.version = 11 : i64} {
  func.func @deft_kernel(%arg0: i32, %arg1: memref<1xf32, #tpu.memory_space<smem>>, %arg2: memref<8x128xf32, #tpu.memory_space<vmem>>, %arg3: memref<1x1xf32, #tpu.memory_space<vmem>>, %arg4: memref<8x128xf32, #tpu.memory_space<vmem>>) attributes {dimension_semantics = [#tpu.dimension_semantics<arbitrary>], iteration_bounds = array<i64: 1>, scalar_prefetch = 0 : i64, scratch_operands = 1 : i64, tpu.core_type = #tpu.core_type<tc>, window_params = [{transform_indices = @transform_0, window_bounds = array<i64: 1>}, {transform_indices = @transform_1, window_bounds = array<i64: 8, 128>}, {pipeline_mode = #tpu.pipeline_mode<synchronous>, transform_indices = @transform_2, window_bounds = array<i64: 1, 1>}]} {
    %c0_i32 = arith.constant 0 : i32
    %0 = arith.cmpi eq, %arg0, %c0_i32 : i32
    %1 = arith.extui %0 : i1 to i32
    %c0_i32_0 = arith.constant 0 : i32
    %2 = arith.cmpi ne, %1, %c0_i32_0 : i32
    scf.if %2 {
      %cst_8 = arith.constant 0.000000e+00 : f32
      %12 = vector.broadcast %cst_8 : f32 to vector<8x128xf32>
      %c0_9 = arith.constant 0 : index
      %c0_10 = arith.constant 0 : index
      %13 = vector.load %arg4[%c0_9, %c0_10] : memref<8x128xf32, #tpu.memory_space<vmem>>, vector<8x128xf32>
      tpu.vector_store %arg4[%c0_9, %c0_10], %12 {strides = array<i32>} : memref<8x128xf32, #tpu.memory_space<vmem>>, vector<8x128xf32>,
    } else {
    }
    %c0 = arith.constant 0 : index
    %c0_1 = arith.constant 0 : index
    %3 = vector.load %arg2[%c0, %c0_1] : memref<8x128xf32, #tpu.memory_space<vmem>>, vector<8x128xf32>
    %c0_2 = arith.constant 0 : index
    %c0_3 = arith.constant 0 : index
    %4 = vector.load %arg4[%c0_2, %c0_3] : memref<8x128xf32, #tpu.memory_space<vmem>>, vector<8x128xf32>
    %5 = vector.shape_cast %3 : vector<8x128xf32> to vector<1x8x128xf32>
    %cst = arith.constant dense<0.000000e+00> : vector<8x128xf32>
    %6 = vector.multi_reduction <add>, %5, %cst [0] : vector<1x8x128xf32> to vector<8x128xf32>
    %7 = arith.addf %4, %6 : vector<8x128xf32>
    %c0_4 = arith.constant 0 : index
    %c0_5 = arith.constant 0 : index
    %8 = vector.load %arg4[%c0_4, %c0_5] : memref<8x128xf32, #tpu.memory_space<vmem>>, vector<8x128xf32>
    tpu.vector_store %arg4[%c0_4, %c0_5], %7 {strides = array<i32>} : memref<8x128xf32, #tpu.memory_space<vmem>>, vector<8x128xf32>,
    %c0_i32_6 = arith.constant 0 : i32
    %9 = arith.cmpi eq, %arg0, %c0_i32_6 : i32
    %10 = arith.extui %9 : i1 to i32
    %c0_i32_7 = arith.constant 0 : i32
    %11 = arith.cmpi ne, %10, %c0_i32_7 : i32
    scf.if %11 {
      %c0_8 = arith.constant 0 : index
      %12 = memref.load %arg1[%c0_8] : memref<1xf32, #tpu.memory_space<smem>>
      %c0_9 = arith.constant 0 : index
      %c0_10 = arith.constant 0 : index
      %13 = vector.load %arg4[%c0_9, %c0_10] : memref<8x128xf32, #tpu.memory_space<vmem>>, vector<8x128xf32>
      %14 = vector.shape_cast %13 : vector<8x128xf32> to vector<1x8x128xf32>
      %cst_11 = arith.constant dense<0.000000e+00> : vector<1xf32>
      %15 = vector.multi_reduction <add>, %14, %cst_11 [1, 2] : vector<1x8x128xf32> to vector<1xf32>
      %16 = vector.shape_cast %15 : vector<1xf32> to vector<1x1x1xf32>
      %17 = vector.extract %16[0, 0, 0] : f32 from vector<1x1x1xf32>
      %18 = arith.mulf %12, %17 : f32
      %19 = vector.broadcast %18 : f32 to vector<1x1xf32>
      %c0_12 = arith.constant 0 : index
      %c0_13 = arith.constant 0 : index
      %20 = vector.load %arg3[%c0_12, %c0_13] : memref<1x1xf32, #tpu.memory_space<vmem>>, vector<1x1xf32>
      tpu.vector_store %arg3[%c0_12, %c0_13], %19 {strides = array<i32>} : memref<1x1xf32, #tpu.memory_space<vmem>>, vector<1x1xf32>,
    } else {
    }
    return
  }
  func.func @transform_0(%arg0: i32) -> i32 {
    %c0_i32 = arith.constant 0 : i32
    %c0_i32_0 = arith.constant 0 : i32
    return %c0_i32 : i32
  }
  func.func @transform_1(%arg0: i32) -> (i32, i32) {
    %c0_i32 = arith.constant 0 : i32
    %c0_i32_0 = arith.constant 0 : i32
    return %arg0, %c0_i32 : i32, i32
  }
  func.func @transform_2(%arg0: i32) -> (i32, i32) {
    %c0_i32 = arith.constant 0 : i32
    %c0_i32_0 = arith.constant 0 : i32
    %c0_i32_1 = arith.constant 0 : i32
    return %c0_i32, %c0_i32_0 : i32, i32
  }
}

</mosaic_0001>

<bundles_post_ra>
// kernel: tpu_custom_call.1
= control target key start
LH: loop header
LB: loop body
LE: loop exit
PB: predicated region body
PF: predicated region fallthrough
CT: control target
= control target key end

     0   :  { %8 = vsyncpa [#allocation5], 0  ;;  %s142_s0 = inlined_call_operand.<no memory space> [shape: f32[1], index: 0, kind: input, shape index: {}]   ;;  %s143_s1 = inlined_call_operand.hbm [shape: f32[8,128], index: 1, kind: input, shape index: {}]   ;;  %s144_s2 = inlined_call_operand.hbm [shape: f32[1,1], index: 2, kind: output, shape index: {}]  }
   0x1   :  { %9 = vsyncpa [#allocation6], 0  ;;  %s116_s9 = smov [#allocation4]  }
   0x2   :  { %s18_s10 = sshll.u32 %s116_s9, 4  ;;  %s19_s10 = int_to_ptr.vmem [resolvable:$true] %s18_s10 }
   0x3   :  { %s80_s11 = scalar_lea.vmem %s19_s10, 128  ;;  %p85_p1 = scmp.lt.s32.totalorder %s19_s10, %s19_s10 }
   0x4   :  { %p81_p0 = scmp.ne.s32.totalorder %s19_s10, %s80_s11  ;;  %p86_p2 = scmp.lt.s32.totalorder %s80_s11, %s80_s11 }
   0x6   :  { %p87_p3 = por %p86_p2, %p85_p1 }
   0x8   :  { %p88_p4 = pnand %p87_p3, %p81_p0 }
   0xa   :  { %91 = shalt.err (!%p88_p4)
}
   0xb   :  { %21 = dma.hbm_to_vmem [thread:$0]  %s143_s1, 128, %s19_s10, [#allocation5]  }
   0xc   :  { %112 = dma.done.wait [#allocation5], 128  }
   0xd   :  { %113 = vsyncadd [#allocation5], 4294967168  ;;  %v30_v0 = vld [vmem:[#allocation4] sm:$0xff]  ;;  %s117_s14 = smov [#allocation7]   ;;  %vm51_vm0 = vcmask 0  }
   0xe   :  { %40 = vadd.xlane.f32.xlu0 %v30_v0  ;;  %s59_s15 = sshll.u32 %s117_s14, 4  ;;  %s60_s15 = int_to_ptr.vmem [resolvable:$true] %s59_s15 }
   0xf   :  { %s92_s1 = scalar_lea.vmem %s60_s15, 16  ;;  %s96_s20 = scalar_lea.vmem %s60_s15, 32 }
  0x10   :  { %p93_p5 = scmp.ne.s32.totalorder %s60_s15, %s92_s1  ;;  %p97_p6 = scmp.lt.s32.totalorder %s60_s15, %s60_s15 }
  0x11   :  { %p98_p7 = scmp.lt.s32.totalorder %s96_s20, %s92_s1 }
  0x13   :  { %p99_p8 = por %p98_p7, %p97_p6 }
  0x15   :  { %p100_p9 = pnand %p99_p8, %p93_p5 }
  0x97   :  { %v41_v1 = vpop.xlane.xlu0 %40 }
  0x98   :  { %v42_v2 = vrot.slane %v41_v1, 4 }
  0x9a   :  { %v43_v3 = vadd.f32 %v42_v2, %v41_v1 }
  0x9c   :  { %v44_v4 = vrot.slane %v43_v3, 2 }
  0x9e   :  { %v45_v5 = vadd.f32 %v44_v4, %v43_v3 }
  0xa0   :  { %v46_v6 = vrot.slane %v45_v5, 1 }
  0xa2   :  { %v47_v7 = vadd.f32 %v46_v6, %v45_v5 }
  0xa4   :  { %68 = vpush %v47_v7 }
  0xd5   :  { %s69_s16 = spop %68 }
  0xd6   :  { %s49_s19 = smul.f32 %s69_s16, %s142_s0 }
  0xd8   :  { %v50_v8 = vstv %s49_s19 }
  0xd9   :  { %52 = vst.msk [vmem:[#allocation7] sm:$0x1] %vm51_vm0, %v50_v8 }
  0xda   :  { %103 = shalt.err (!%p100_p9)
}
  0xdb   :  { %62 = dma.vmem_to_hbm [thread:$0]  %s60_s15, 16, %s144_s2, [#allocation6]  }
  0xdc   :  { %114 = dma.done.wait [#allocation6], 16  }
  0xdd   :  { %115 = vsyncadd [#allocation6], 4294967280 }
  0xde   :  { %66 = vsyncpa [#allocation5], 1 }
  0xdf   :  { %67 = vsyncpa [#allocation6], 1 }

</bundles_post_ra>
